<compile_context>
chip_gen: v5e
topology: v5e:2x2
jax: 0.10.0
libtpu: 0.0.40
codegen_flags: <defaults>
</compile_context>

<pallas_src>
import functools
import numpy as np
import jax
import jax.numpy as jnp
from jax import lax
from jax.experimental import pallas as pl
from jax.experimental.pallas import tpu as pltpu


def _biatt_kernel(h_ref, u_ref, hmask_ref, umask_ref,
                  w_in1_ref, w_mem1_ref,
                  w_in2_ref, b_in2_ref,
                  w_mem2_ref, b_mem2_ref,
                  w_out_ref, b_out_ref,
                  out_ref, out2_ref,
                  *, inv_scale):
    f32, bf16 = jnp.float32, jnp.bfloat16

    w_in1 = w_in1_ref[...]      # (1, D)  f32, lane-dense
    w_mem1 = w_mem1_ref[...]    # (1, D)  f32, lane-dense
    w_in2 = w_in2_ref[...]      # (D, H)  bf16
    w_mem2 = w_mem2_ref[...]    # (D, H)  bf16
    w_out = w_out_ref[...]      # (4H, H) bf16
    b_in2 = b_in2_ref[...]      # (1, H)  f32
    b_mem2 = b_mem2_ref[...]    # (1, H)  f32
    b_out = b_out_ref[...]      # (1, H)  f32

    block_b = h_ref.shape[0]
    for b in range(block_b):    # unrolled: amortises the per-grid-step fixed cost
        h_bf = h_ref[b]                                  # (Lh, D) bf16
        u_bf = u_ref[b]                                  # (Lu, D) bf16
        h_f = h_bf.astype(f32)

        # ---- attention logits ------------------------------------------------
        # cross/scale + u_dot folded into ONE MXU pass: (h/scale + w_mem1) @ u^T
        h_s = (h_f * inv_scale + w_mem1).astype(bf16)                  # (Lh, D)
        att = lax.dot_general(h_s, u_bf, (((1,), (1,)), ((), ())),
                              preferred_element_type=f32)              # (Lh, Lu)
        # h_dot on the VPU/XLU with a lane-dense (1, D) weight (no (D,1) matmul)
        h_dot = jnp.sum(h_f * w_in1, axis=-1, keepdims=True)           # (Lh, 1)
        att = att + h_dot

        # ---- mask built in-kernel from the 1-D masks (single select) ---------
        keep = (hmask_ref[b] != 0.0) & (umask_ref[b] != 0.0)           # (Lh,Lu)
        att = att + jnp.where(keep, 0.0, -10000.0)        # == att - 1e4*(1-mask)

        # ---- projections (bf16 MXU operands, f32 accumulation) ---------------
        h2 = jnp.dot(h_bf, w_in2, preferred_element_type=f32) + b_in2    # (Lh,H)
        u2 = jnp.dot(u_bf, w_mem2, preferred_element_type=f32) + b_mem2  # (Lu,H)

        # ---- softmax over u_len; normalisation fused post-matmul (EUP recip) -
        row_max = jnp.max(att, axis=-1, keepdims=True)                 # (Lh, 1)
        p = jnp.exp(att - row_max)                                     # (Lh, Lu)
        s = jnp.sum(p, axis=-1, keepdims=True)                         # (Lh, 1)
        o1 = jnp.dot(p.astype(bf16), u2.astype(bf16),
                     preferred_element_type=f32)                       # (Lh, H)
        o1 = o1 * pl.reciprocal(s, approx=True)

        # ---- softmax over h_len of per-row maxima; output_two as MXU matvec --
        g = jnp.exp(row_max - jnp.max(row_max, axis=0, keepdims=True))  # (Lh, 1)
        w2 = g * pl.reciprocal(jnp.sum(g, axis=0, keepdims=True), approx=True)
        o2 = lax.dot_general(w2, h2, (((0,), (0,)), ((), ())),
                             preferred_element_type=f32)               # (1, H)

        # ---- output projection: single long-K (Lh,4H)@(4H,H) matmul ----------
        feat = jnp.concatenate([h2, o1, h2 * o1, o2 * o1], axis=-1).astype(bf16)
        out = jnp.dot(feat, w_out, preferred_element_type=f32) + b_out  # (Lh, H)

        out_ref[b] = out.astype(out_ref.dtype)
        out2_ref[b] = o2.astype(out2_ref.dtype)


def _pick_block_b(batch):
    """Batch several examples per grid step, but keep >=2 steps for megacore."""
    for bb in (8, 4, 2):
        if batch % bb == 0 and batch // bb >= 2:
            return bb
    return 1


def weighted_biattention(h, u, h_mask, u_mask, params, *, block_b=None):
    """h: (B,Lh,D)  u: (B,Lu,D)  h_mask: (B,Lh) bool  u_mask: (B,Lu) bool."""
    B, Lh, D = h.shape
    _, Lu, _ = u.shape
    H = params["w_in2"].shape[1]
    inv_scale = 1.0 / float(np.sqrt(D))

    if block_b is None:
        block_b = _pick_block_b(B)
    assert B % block_b == 0, (B, block_b)
    grid = (B // block_b,)

    # bf16 activations in HBM: halves DMA bytes and feeds the MXU at full rate
    h_bf = h.astype(jnp.bfloat16)
    u_bf = u.astype(jnp.bfloat16)
    # tiny 1-D masks instead of a materialised (B, Lh, Lu) f32 mask
    hm = h_mask.astype(jnp.float32)[:, :, None]        # (B, Lh, 1)
    um = u_mask.astype(jnp.float32)[:, None, :]        # (B, 1, Lu)

    w_in1 = params["w_in1"].reshape(1, D).astype(jnp.float32)     # lane-dense
    w_mem1 = params["w_mem1"].reshape(1, D).astype(jnp.float32)   # lane-dense
    w_in2 = params["w_in2"].astype(jnp.bfloat16)
    w_mem2 = params["w_mem2"].astype(jnp.bfloat16)
    w_out = params["w_out"].astype(jnp.bfloat16)
    b_in2 = params["b_in2"].reshape(1, H).astype(jnp.float32)
    b_mem2 = params["b_mem2"].reshape(1, H).astype(jnp.float32)
    b_out = params["b_out"].reshape(1, H).astype(jnp.float32)

    kernel = functools.partial(_biatt_kernel, inv_scale=inv_scale)

    def batched(*shape):
        n = len(shape)
        return pl.BlockSpec((block_b,) + shape, lambda i: (i,) + (0,) * n)

    def const(*shape):
        # grid-invariant weights: single buffer (no point double-buffering them)
        return pl.BlockSpec(shape, lambda i: (0,) * len(shape),
                            pipeline_mode=pl.Buffered(1))

    out, out_two = pl.pallas_call(
        kernel,
        out_shape=(jax.ShapeDtypeStruct((B, Lh, H), jnp.float32),
                   jax.ShapeDtypeStruct((B, 1, H), jnp.float32)),
        grid_spec=pltpu.PrefetchScalarGridSpec(
            num_scalar_prefetch=0,
            grid=grid,
            in_specs=[
                batched(Lh, D),            # h (bf16)
                batched(Lu, D),            # u (bf16)
                batched(Lh, 1),            # h_mask
                batched(1, Lu),            # u_mask
                const(1, D),               # w_in1 (lane-dense)
                const(1, D),               # w_mem1 (lane-dense)
                const(D, H),               # w_in2
                const(1, H),               # b_in2
                const(D, H),               # w_mem2
                const(1, H),               # b_mem2
                const(4 * H, H),           # w_out
                const(1, H),               # b_out
            ],
            out_specs=[
                batched(Lh, H),            # output
                batched(1, H),             # output_two
            ],
        ),
        compiler_params=pltpu.CompilerParams(
            dimension_semantics=("parallel",)),
    )(h_bf, u_bf, hm, um,
      w_in1, w_mem1, w_in2, b_in2, w_mem2, b_mem2, w_out, b_out)

    return out, out_two[:, 0, :]


def _ref_forward(h, u, h_mask, u_mask, params):
    """Pure-JAX f32 reference mirroring the PyTorch forward (eval mode)."""
    D = h.shape[-1]
    dot_scale = float(np.sqrt(D))
    hu = (u_mask[:, None, :] & h_mask[:, :, None]).astype(jnp.float32)
    h_dot = h @ params["w_in1"]                                    # (B,Lh,1)
    u_dot = jnp.transpose(u @ params["w_mem1"], (0, 2, 1))         # (B,1,Lu)
    cross = jnp.einsum("bld,bmd->blm", h, u) / dot_scale
    att = h_dot + u_dot + cross - 10000.0 * (1.0 - hu)
    h2 = h @ params["w_in2"] + params["b_in2"]
    u2 = u @ params["w_mem2"] + params["b_mem2"]
    w1 = jax.nn.softmax(att, axis=-1)
    o1 = jnp.einsum("blm,bmh->blh", w1, u2)
    w2 = jax.nn.softmax(jnp.max(att, axis=-1), axis=-1)[:, None, :]
    o2 = jnp.einsum("blm,bmh->blh", w2, h2)
    feat = jnp.concatenate([h2, o1, h2 * o1, o2 * o1], axis=-1)
    out = feat @ params["w_out"] + params["b_out"]
    return out, o2[:, 0, :]


if __name__ == "__main__":
    B, Lh, Lu, D, H = 4, 16, 8, 32, 32

    key = jax.random.PRNGKey(0)
    keys = jax.random.split(key, 12)

    h = jax.random.normal(keys[0], (B, Lh, D), jnp.float32)
    u = jax.random.normal(keys[1], (B, Lu, D), jnp.float32)
    # deterministic masks with some padding
    h_len = jnp.array([[Lh], [Lh - 4], [Lh - 9], [Lh - 2]])
    u_len = jnp.array([[Lu], [Lu - 2], [Lu - 5], [Lu - 1]])
    h_mask = jnp.arange(Lh)[None, :] < h_len
    u_mask = jnp.arange(Lu)[None, :] < u_len

    def uinit(k, shape, fan_in):
        bound = 1.0 / np.sqrt(fan_in)
        return jax.random.uniform(k, shape, jnp.float32, -bound, bound)

    params = {
        "w_in1":  uinit(keys[2], (D, 1), D),
        "w_mem1": uinit(keys[3], (D, 1), D),
        "w_in2":  uinit(keys[4], (D, H), D),
        "b_in2":  uinit(keys[5], (1, H), D),
        "w_mem2": uinit(keys[6], (D, H), D),
        "b_mem2": uinit(keys[7], (1, H), D),
        "w_out":  uinit(keys[8], (4 * H, H), 4 * H),
        "b_out":  uinit(keys[9], (1, H), 4 * H),
    }

    out, out_two = weighted_biattention(h, u, h_mask, u_mask, params)
    jax.block_until_ready((out, out_two))

    ref_out, ref_out_two = _ref_forward(h, u, h_mask, u_mask, params)
    # bf16 matmul operands + approximate reciprocal => looser tolerance than f32
    np.testing.assert_allclose(np.asarray(out), np.asarray(ref_out),
                               rtol=3e-2, atol=3e-2)
    np.testing.assert_allclose(np.asarray(out_two), np.asarray(ref_out_two),
                               rtol=3e-2, atol=3e-2)

    print("KERNEL_OK")
</pallas_src>

<mosaic_0001>
module attributes {stable_mosaic.version = 11 : i64} {
  func.func @_biatt_kernel(%arg0: i32, %arg1: memref<2x16x32xbf16, #tpu.memory_space<vmem>>, %arg2: memref<2x8x32xbf16, #tpu.memory_space<vmem>>, %arg3: memref<2x16x1xf32, #tpu.memory_space<vmem>>, %arg4: memref<2x1x8xf32, #tpu.memory_space<vmem>>, %arg5: memref<1x32xf32, #tpu.memory_space<vmem>>, %arg6: memref<1x32xf32, #tpu.memory_space<vmem>>, %arg7: memref<32x32xbf16, #tpu.memory_space<vmem>>, %arg8: memref<1x32xf32, #tpu.memory_space<vmem>>, %arg9: memref<32x32xbf16, #tpu.memory_space<vmem>>, %arg10: memref<1x32xf32, #tpu.memory_space<vmem>>, %arg11: memref<128x32xbf16, #tpu.memory_space<vmem>>, %arg12: memref<1x32xf32, #tpu.memory_space<vmem>>, %arg13: memref<2x16x32xf32, #tpu.memory_space<vmem>>, %arg14: memref<2x1x32xf32, #tpu.memory_space<vmem>>) attributes {dimension_semantics = [#tpu.dimension_semantics<parallel>], iteration_bounds = array<i64: 2>, scalar_prefetch = 0 : i64, scratch_operands = 0 : i64, tpu.core_type = #tpu.core_type<tc>, window_params = [{transform_indices = @transform_0, window_bounds = array<i64: 2, 16, 32>}, {transform_indices = @transform_1, window_bounds = array<i64: 2, 8, 32>}, {transform_indices = @transform_2, window_bounds = array<i64: 2, 16, 1>}, {transform_indices = @transform_3, window_bounds = array<i64: 2, 1, 8>}, {pipeline_mode = #tpu.pipeline_mode<synchronous>, transform_indices = @transform_4, window_bounds = array<i64: 1, 32>}, {pipeline_mode = #tpu.pipeline_mode<synchronous>, transform_indices = @transform_5, window_bounds = array<i64: 1, 32>}, {pipeline_mode = #tpu.pipeline_mode<synchronous>, transform_indices = @transform_6, window_bounds = array<i64: 32, 32>}, {pipeline_mode = #tpu.pipeline_mode<synchronous>, transform_indices = @transform_7, window_bounds = array<i64: 1, 32>}, {pipeline_mode = #tpu.pipeline_mode<synchronous>, transform_indices = @transform_8, window_bounds = array<i64: 32, 32>}, {pipeline_mode = #tpu.pipeline_mode<synchronous>, transform_indices = @transform_9, window_bounds = array<i64: 1, 32>}, {pipeline_mode = #tpu.pipeline_mode<synchronous>, transform_indices = @transform_10, window_bounds = array<i64: 128, 32>}, {pipeline_mode = #tpu.pipeline_mode<synchronous>, transform_indices = @transform_11, window_bounds = array<i64: 1, 32>}, {transform_indices = @transform_12, window_bounds = array<i64: 2, 16, 32>}, {transform_indices = @transform_13, window_bounds = array<i64: 2, 1, 32>}]} {
    %c0 = arith.constant 0 : index
    %c0_0 = arith.constant 0 : index
    %0 = vector.load %arg5[%c0, %c0_0] : memref<1x32xf32, #tpu.memory_space<vmem>>, vector<1x32xf32>
    %c0_1 = arith.constant 0 : index
    %c0_2 = arith.constant 0 : index
    %1 = vector.load %arg6[%c0_1, %c0_2] : memref<1x32xf32, #tpu.memory_space<vmem>>, vector<1x32xf32>
    %c0_3 = arith.constant 0 : index
    %c0_4 = arith.constant 0 : index
    %2 = vector.load %arg7[%c0_3, %c0_4] : memref<32x32xbf16, #tpu.memory_space<vmem>>, vector<32x32xbf16>
    %c0_5 = arith.constant 0 : index
    %c0_6 = arith.constant 0 : index
    %3 = vector.load %arg9[%c0_5, %c0_6] : memref<32x32xbf16, #tpu.memory_space<vmem>>, vector<32x32xbf16>
    %c0_7 = arith.constant 0 : index
    %c0_8 = arith.constant 0 : index
    %4 = vector.load %arg11[%c0_7, %c0_8] : memref<128x32xbf16, #tpu.memory_space<vmem>>, vector<128x32xbf16>
    %c0_9 = arith.constant 0 : index
    %c0_10 = arith.constant 0 : index
    %5 = vector.load %arg8[%c0_9, %c0_10] : memref<1x32xf32, #tpu.memory_space<vmem>>, vector<1x32xf32>
    %c0_11 = arith.constant 0 : index
    %c0_12 = arith.constant 0 : index
    %6 = vector.load %arg10[%c0_11, %c0_12] : memref<1x32xf32, #tpu.memory_space<vmem>>, vector<1x32xf32>
    %c0_13 = arith.constant 0 : index
    %c0_14 = arith.constant 0 : index
    %7 = vector.load %arg12[%c0_13, %c0_14] : memref<1x32xf32, #tpu.memory_space<vmem>>, vector<1x32xf32>
    %c0_15 = arith.constant 0 : index
    %c0_16 = arith.constant 0 : index
    %c0_17 = arith.constant 0 : index
    %8 = vector.load %arg1[%c0_15, %c0_16, %c0_17] : memref<2x16x32xbf16, #tpu.memory_space<vmem>>, vector<1x16x32xbf16>
    %9 = vector.shape_cast %8 : vector<1x16x32xbf16> to vector<16x32xbf16>
    %c0_18 = arith.constant 0 : index
    %c0_19 = arith.constant 0 : index
    %c0_20 = arith.constant 0 : index
    %10 = vector.load %arg2[%c0_18, %c0_19, %c0_20] : memref<2x8x32xbf16, #tpu.memory_space<vmem>>, vector<1x8x32xbf16>
    %11 = vector.shape_cast %10 : vector<1x8x32xbf16> to vector<8x32xbf16>
    %12 = arith.extf %9 : vector<16x32xbf16> to vector<16x32xf32>
    %cst = arith.constant 0.176776692 : f32
    %13 = vector.broadcast %cst : f32 to vector<16x32xf32>
    %14 = arith.mulf %12, %13 : vector<16x32xf32>
    %15 = vector.broadcast %1 : vector<1x32xf32> to vector<16x32xf32>
    %16 = arith.addf %14, %15 : vector<16x32xf32>
    %17 = arith.truncf %16 : vector<16x32xf32> to vector<16x32xbf16>
    %cst_21 = arith.constant dense<0.000000e+00> : vector<16x8xf32>
    %18 = tpu.matmul %17, %11, %cst_21 {dimension_numbers = #tpu.dot_dimension_numbers<[1], [1], [0], [0], [0, 0, 1, 0], [], []>} : vector<16x32xbf16>, vector<8x32xbf16>, vector<16x8xf32> -> vector<16x8xf32>
    %19 = vector.broadcast %0 : vector<1x32xf32> to vector<16x32xf32>
    %20 = arith.mulf %12, %19 : vector<16x32xf32>
    %cst_22 = arith.constant dense<0.000000e+00> : vector<16xf32>
    %21 = vector.multi_reduction <add>, %20, %cst_22 [1] : vector<16x32xf32> to vector<16xf32>
    %22 = vector.shape_cast %21 : vector<16xf32> to vector<16x1xf32>
    %23 = vector.broadcast %22 : vector<16x1xf32> to vector<16x8xf32>
    %24 = arith.addf %18, %23 : vector<16x8xf32>
    %c0_23 = arith.constant 0 : index
    %c0_24 = arith.constant 0 : index
    %c0_25 = arith.constant 0 : index
    %25 = vector.load %arg3[%c0_23, %c0_24, %c0_25] : memref<2x16x1xf32, #tpu.memory_space<vmem>>, vector<1x16x1xf32>
    %26 = vector.shape_cast %25 : vector<1x16x1xf32> to vector<16x1xf32>
    %cst_26 = arith.constant 0.000000e+00 : f32
    %27 = vector.broadcast %cst_26 : f32 to vector<16x1xf32>
    %28 = arith.cmpf one, %26, %27 : vector<16x1xf32>
    %c0_27 = arith.constant 0 : index
    %c0_28 = arith.constant 0 : index
    %c0_29 = arith.constant 0 : index
    %29 = vector.load %arg4[%c0_27, %c0_28, %c0_29] : memref<2x1x8xf32, #tpu.memory_space<vmem>>, vector<1x1x8xf32>
    %30 = vector.shape_cast %29 : vector<1x1x8xf32> to vector<1x8xf32>
    %cst_30 = arith.constant 0.000000e+00 : f32
    %31 = vector.broadcast %cst_30 : f32 to vector<1x8xf32>
    %32 = arith.cmpf one, %30, %31 : vector<1x8xf32>
    %33 = vector.broadcast %28 : vector<16x1xi1> to vector<16x8xi1>
    %34 = vector.broadcast %32 : vector<1x8xi1> to vector<16x8xi1>
    %35 = arith.andi %33, %34 : vector<16x8xi1>
    %cst_31 = arith.constant 0.000000e+00 : f32
    %cst_32 = arith.constant -1.000000e+04 : f32
    %36 = vector.broadcast %cst_31 : f32 to vector<16x8xf32>
    %37 = vector.broadcast %cst_32 : f32 to vector<16x8xf32>
    %38 = arith.select %35, %36, %37 : vector<16x8xi1>, vector<16x8xf32>
    %39 = arith.addf %24, %38 : vector<16x8xf32>
    %cst_33 = arith.constant dense<0.000000e+00> : vector<16x32xf32>
    %40 = tpu.matmul %9, %2, %cst_33 {dimension_numbers = #tpu.dot_dimension_numbers<[1], [0], [0], [1], [0, 0, 1, 1], [], []>} : vector<16x32xbf16>, vector<32x32xbf16>, vector<16x32xf32> -> vector<16x32xf32>
    %41 = vector.broadcast %5 : vector<1x32xf32> to vector<16x32xf32>
    %42 = arith.addf %40, %41 : vector<16x32xf32>
    %cst_34 = arith.constant dense<0.000000e+00> : vector<8x32xf32>
    %43 = tpu.matmul %11, %3, %cst_34 {dimension_numbers = #tpu.dot_dimension_numbers<[1], [0], [0], [1], [0, 0, 1, 1], [], []>} : vector<8x32xbf16>, vector<32x32xbf16>, vector<8x32xf32> -> vector<8x32xf32>
    %44 = vector.broadcast %6 : vector<1x32xf32> to vector<8x32xf32>
    %45 = arith.addf %43, %44 : vector<8x32xf32>
    %cst_35 = arith.constant dense<0xFF800000> : vector<16xf32>
    %46 = vector.multi_reduction <maximumf>, %39, %cst_35 [1] : vector<16x8xf32> to vector<16xf32>
    %47 = vector.shape_cast %46 : vector<16xf32> to vector<16x1xf32>
    %48 = vector.broadcast %47 : vector<16x1xf32> to vector<16x8xf32>
    %49 = arith.subf %39, %48 : vector<16x8xf32>
    %50 = math.exp %49 : vector<16x8xf32>
    %cst_36 = arith.constant dense<0.000000e+00> : vector<16xf32>
    %51 = vector.multi_reduction <add>, %50, %cst_36 [1] : vector<16x8xf32> to vector<16xf32>
    %52 = vector.shape_cast %51 : vector<16xf32> to vector<16x1xf32>
    %53 = arith.truncf %50 : vector<16x8xf32> to vector<16x8xbf16>
    %54 = arith.truncf %45 : vector<8x32xf32> to vector<8x32xbf16>
    %cst_37 = arith.constant dense<0.000000e+00> : vector<16x32xf32>
    %55 = tpu.matmul %53, %54, %cst_37 {dimension_numbers = #tpu.dot_dimension_numbers<[1], [0], [0], [1], [0, 0, 1, 1], [], []>} : vector<16x8xbf16>, vector<8x32xbf16>, vector<16x32xf32> -> vector<16x32xf32>
    %56 = tpu.reciprocal %52 {approx = true} : vector<16x1xf32> -> vector<16x1xf32>
    %57 = vector.broadcast %56 : vector<16x1xf32> to vector<16x32xf32>
    %58 = arith.mulf %55, %57 : vector<16x32xf32>
    %cst_38 = arith.constant dense<0xFF800000> : vector<1xf32>
    %59 = vector.multi_reduction <maximumf>, %47, %cst_38 [0] : vector<16x1xf32> to vector<1xf32>
    %60 = vector.shape_cast %59 : vector<1xf32> to vector<1x1xf32>
    %61 = vector.broadcast %60 : vector<1x1xf32> to vector<16x1xf32>
    %62 = arith.subf %47, %61 : vector<16x1xf32>
    %63 = math.exp %62 : vector<16x1xf32>
    %cst_39 = arith.constant dense<0.000000e+00> : vector<1xf32>
    %64 = vector.multi_reduction <add>, %63, %cst_39 [0] : vector<16x1xf32> to vector<1xf32>
    %65 = vector.shape_cast %64 : vector<1xf32> to vector<1x1xf32>
    %66 = tpu.reciprocal %65 {approx = true} : vector<1x1xf32> -> vector<1x1xf32>
    %67 = vector.broadcast %66 : vector<1x1xf32> to vector<16x1xf32>
    %68 = arith.mulf %63, %67 : vector<16x1xf32>
    %cst_40 = arith.constant dense<0.000000e+00> : vector<1x32xf32>
    %69 = tpu.matmul %68, %42, %cst_40 {dimension_numbers = #tpu.dot_dimension_numbers<[0], [0], [1], [1], [0, 1, 1, 1], [], []>} : vector<16x1xf32>, vector<16x32xf32>, vector<1x32xf32> -> vector<1x32xf32>
    %70 = arith.mulf %42, %58 : vector<16x32xf32>
    %71 = vector.broadcast %69 : vector<1x32xf32> to vector<16x32xf32>
    %72 = arith.mulf %71, %58 : vector<16x32xf32>
    %73 = tpu.concatenate %42, %58, %70, %72 in 1 : vector<16x32xf32>, vector<16x32xf32>, vector<16x32xf32>, vector<16x32xf32> -> vector<16x128xf32>
    %74 = arith.truncf %73 : vector<16x128xf32> to vector<16x128xbf16>
    %cst_41 = arith.constant dense<0.000000e+00> : vector<16x32xf32>
    %75 = tpu.matmul %74, %4, %cst_41 {dimension_numbers = #tpu.dot_dimension_numbers<[1], [0], [0], [1], [0, 0, 1, 1], [], []>} : vector<16x128xbf16>, vector<128x32xbf16>, vector<16x32xf32> -> vector<16x32xf32>
    %76 = vector.broadcast %7 : vector<1x32xf32> to vector<16x32xf32>
    %77 = arith.addf %75, %76 : vector<16x32xf32>
    %c0_42 = arith.constant 0 : index
    %c0_43 = arith.constant 0 : index
    %c0_44 = arith.constant 0 : index
    %78 = vector.load %arg13[%c0_42, %c0_43, %c0_44] : memref<2x16x32xf32, #tpu.memory_space<vmem>>, vector<1x16x32xf32>
    %79 = vector.shape_cast %78 : vector<1x16x32xf32> to vector<16x32xf32>
    %80 = vector.shape_cast %77 : vector<16x32xf32> to vector<1x16x32xf32>
    tpu.vector_store %arg13[%c0_42, %c0_43, %c0_44], %80 {strides = array<i32>} : memref<2x16x32xf32, #tpu.memory_space<vmem>>, vector<1x16x32xf32>,
    %c0_45 = arith.constant 0 : index
    %c0_46 = arith.constant 0 : index
    %c0_47 = arith.constant 0 : index
    %81 = vector.load %arg14[%c0_45, %c0_46, %c0_47] : memref<2x1x32xf32, #tpu.memory_space<vmem>>, vector<1x1x32xf32>
    %82 = vector.shape_cast %81 : vector<1x1x32xf32> to vector<1x32xf32>
    %83 = vector.shape_cast %69 : vector<1x32xf32> to vector<1x1x32xf32>
    tpu.vector_store %arg14[%c0_45, %c0_46, %c0_47], %83 {strides = array<i32>} : memref<2x1x32xf32, #tpu.memory_space<vmem>>, vector<1x1x32xf32>,
    %c1 = arith.constant 1 : index
    %c0_48 = arith.constant 0 : index
    %c0_49 = arith.constant 0 : index
    %84 = vector.load %arg1[%c1, %c0_48, %c0_49] : memref<2x16x32xbf16, #tpu.memory_space<vmem>>, vector<1x16x32xbf16>
    %85 = vector.shape_cast %84 : vector<1x16x32xbf16> to vector<16x32xbf16>
    %c1_50 = arith.constant 1 : index
    %c0_51 = arith.constant 0 : index
    %c0_52 = arith.constant 0 : index
    %86 = vector.load %arg2[%c1_50, %c0_51, %c0_52] : memref<2x8x32xbf16, #tpu.memory_space<vmem>>, vector<1x8x32xbf16>
    %87 = vector.shape_cast %86 : vector<1x8x32xbf16> to vector<8x32xbf16>
    %88 = arith.extf %85 : vector<16x32xbf16> to vector<16x32xf32>
    %cst_53 = arith.constant 0.176776692 : f32
    %89 = vector.broadcast %cst_53 : f32 to vector<16x32xf32>
    %90 = arith.mulf %88, %89 : vector<16x32xf32>
    %91 = vector.broadcast %1 : vector<1x32xf32> to vector<16x32xf32>
    %92 = arith.addf %90, %91 : vector<16x32xf32>
    %93 = arith.truncf %92 : vector<16x32xf32> to vector<16x32xbf16>
    %cst_54 = arith.constant dense<0.000000e+00> : vector<16x8xf32>
    %94 = tpu.matmul %93, %87, %cst_54 {dimension_numbers = #tpu.dot_dimension_numbers<[1], [1], [0], [0], [0, 0, 1, 0], [], []>} : vector<16x32xbf16>, vector<8x32xbf16>, vector<16x8xf32> -> vector<16x8xf32>
    %95 = vector.broadcast %0 : vector<1x32xf32> to vector<16x32xf32>
    %96 = arith.mulf %88, %95 : vector<16x32xf32>
    %cst_55 = arith.constant dense<0.000000e+00> : vector<16xf32>
    %97 = vector.multi_reduction <add>, %96, %cst_55 [1] : vector<16x32xf32> to vector<16xf32>
    %98 = vector.shape_cast %97 : vector<16xf32> to vector<16x1xf32>
    %99 = vector.broadcast %98 : vector<16x1xf32> to vector<16x8xf32>
    %100 = arith.addf %94, %99 : vector<16x8xf32>
    %c1_56 = arith.constant 1 : index
    %c0_57 = arith.constant 0 : index
    %c0_58 = arith.constant 0 : index
    %101 = vector.load %arg3[%c1_56, %c0_57, %c0_58] : memref<2x16x1xf32, #tpu.memory_space<vmem>>, vector<1x16x1xf32>
    %102 = vector.shape_cast %101 : vector<1x16x1xf32> to vector<16x1xf32>
    %cst_59 = arith.constant 0.000000e+00 : f32
    %103 = vector.broadcast %cst_59 : f32 to vector<16x1xf32>
    %104 = arith.cmpf one, %102, %103 : vector<16x1xf32>
    %c1_60 = arith.constant 1 : index
    %c0_61 = arith.constant 0 : index
    %c0_62 = arith.constant 0 : index
    %105 = vector.load %arg4[%c1_60, %c0_61, %c0_62] : memref<2x1x8xf32, #tpu.memory_space<vmem>>, vector<1x1x8xf32>
    %106 = vector.shape_cast %105 : vector<1x1x8xf32> to vector<1x8xf32>
    %cst_63 = arith.constant 0.000000e+00 : f32
    %107 = vector.broadcast %cst_63 : f32 to vector<1x8xf32>
    %108 = arith.cmpf one, %106, %107 : vector<1x8xf32>
    %109 = vector.broadcast %104 : vector<16x1xi1> to vector<16x8xi1>
    %110 = vector.broadcast %108 : vector<1x8xi1> to vector<16x8xi1>
    %111 = arith.andi %109, %110 : vector<16x8xi1>
    %cst_64 = arith.constant 0.000000e+00 : f32
    %cst_65 = arith.constant -1.000000e+04 : f32
    %112 = vector.broadcast %cst_64 : f32 to vector<16x8xf32>
    %113 = vector.broadcast %cst_65 : f32 to vector<16x8xf32>
    %114 = arith.select %111, %112, %113 : vector<16x8xi1>, vector<16x8xf32>
    %115 = arith.addf %100, %114 : vector<16x8xf32>
    %cst_66 = arith.constant dense<0.000000e+00> : vector<16x32xf32>
    %116 = tpu.matmul %85, %2, %cst_66 {dimension_numbers = #tpu.dot_dimension_numbers<[1], [0], [0], [1], [0, 0, 1, 1], [], []>} : vector<16x32xbf16>, vector<32x32xbf16>, vector<16x32xf32> -> vector<16x32xf32>
    %117 = vector.broadcast %5 : vector<1x32xf32> to vector<16x32xf32>
    %118 = arith.addf %116, %117 : vector<16x32xf32>
    %cst_67 = arith.constant dense<0.000000e+00> : vector<8x32xf32>
    %119 = tpu.matmul %87, %3, %cst_67 {dimension_numbers = #tpu.dot_dimension_numbers<[1], [0], [0], [1], [0, 0, 1, 1], [], []>} : vector<8x32xbf16>, vector<32x32xbf16>, vector<8x32xf32> -> vector<8x32xf32>
    %120 = vector.broadcast %6 : vector<1x32xf32> to vector<8x32xf32>
    %121 = arith.addf %119, %120 : vector<8x32xf32>
    %cst_68 = arith.constant dense<0xFF800000> : vector<16xf32>
    %122 = vector.multi_reduction <maximumf>, %115, %cst_68 [1] : vector<16x8xf32> to vector<16xf32>
    %123 = vector.shape_cast %122 : vector<16xf32> to vector<16x1xf32>
    %124 = vector.broadcast %123 : vector<16x1xf32> to vector<16x8xf32>
    %125 = arith.subf %115, %124 : vector<16x8xf32>
    %126 = math.exp %125 : vector<16x8xf32>
    %cst_69 = arith.constant dense<0.000000e+00> : vector<16xf32>
    %127 = vector.multi_reduction <add>, %126, %cst_69 [1] : vector<16x8xf32> to vector<16xf32>
    %128 = vector.shape_cast %127 : vector<16xf32> to vector<16x1xf32>
    %129 = arith.truncf %126 : vector<16x8xf32> to vector<16x8xbf16>
    %130 = arith.truncf %121 : vector<8x32xf32> to vector<8x32xbf16>
    %cst_70 = arith.constant dense<0.000000e+00> : vector<16x32xf32>
    %131 = tpu.matmul %129, %130, %cst_70 {dimension_numbers = #tpu.dot_dimension_numbers<[1], [0], [0], [1], [0, 0, 1, 1], [], []>} : vector<16x8xbf16>, vector<8x32xbf16>, vector<16x32xf32> -> vector<16x32xf32>
    %132 = tpu.reciprocal %128 {approx = true} : vector<16x1xf32> -> vector<16x1xf32>
    %133 = vector.broadcast %132 : vector<16x1xf32> to vector<16x32xf32>
    %134 = arith.mulf %131, %133 : vector<16x32xf32>
    %cst_71 = arith.constant dense<0xFF800000> : vector<1xf32>
    %135 = vector.multi_reduction <maximumf>, %123, %cst_71 [0] : vector<16x1xf32> to vector<1xf32>
    %136 = vector.shape_cast %135 : vector<1xf32> to vector<1x1xf32>
    %137 = vector.broadcast %136 : vector<1x1xf32> to vector<16x1xf32>
    %138 = arith.subf %123, %137 : vector<16x1xf32>
    %139 = math.exp %138 : vector<16x1xf32>
    %cst_72 = arith.constant dense<0.000000e+00> : vector<1xf32>
    %140 = vector.multi_reduction <add>, %139, %cst_72 [0] : vector<16x1xf32> to vector<1xf32>
    %141 = vector.shape_cast %140 : vector<1xf32> to vector<1x1xf32>
    %142 = tpu.reciprocal %141 {approx = true} : vector<1x1xf32> -> vector<1x1xf32>
    %143 = vector.broadcast %142 : vector<1x1xf32> to vector<16x1xf32>
    %144 = arith.mulf %139, %143 : vector<16x1xf32>
    %cst_73 = arith.constant dense<0.000000e+00> : vector<1x32xf32>
    %145 = tpu.matmul %144, %118, %cst_73 {dimension_numbers = #tpu.dot_dimension_numbers<[0], [0], [1], [1], [0, 1, 1, 1], [], []>} : vector<16x1xf32>, vector<16x32xf32>, vector<1x32xf32> -> vector<1x32xf32>
    %146 = arith.mulf %118, %134 : vector<16x32xf32>
    %147 = vector.broadcast %145 : vector<1x32xf32> to vector<16x32xf32>
    %148 = arith.mulf %147, %134 : vector<16x32xf32>
    %149 = tpu.concatenate %118, %134, %146, %148 in 1 : vector<16x32xf32>, vector<16x32xf32>, vector<16x32xf32>, vector<16x32xf32> -> vector<16x128xf32>
    %150 = arith.truncf %149 : vector<16x128xf32> to vector<16x128xbf16>
    %cst_74 = arith.constant dense<0.000000e+00> : vector<16x32xf32>
    %151 = tpu.matmul %150, %4, %cst_74 {dimension_numbers = #tpu.dot_dimension_numbers<[1], [0], [0], [1], [0, 0, 1, 1], [], []>} : vector<16x128xbf16>, vector<128x32xbf16>, vector<16x32xf32> -> vector<16x32xf32>
    %152 = vector.broadcast %7 : vector<1x32xf32> to vector<16x32xf32>
    %153 = arith.addf %151, %152 : vector<16x32xf32>
    %c1_75 = arith.constant 1 : index
    %c0_76 = arith.constant 0 : index
    %c0_77 = arith.constant 0 : index
    %154 = vector.load %arg13[%c1_75, %c0_76, %c0_77] : memref<2x16x32xf32, #tpu.memory_space<vmem>>, vector<1x16x32xf32>
    %155 = vector.shape_cast %154 : vector<1x16x32xf32> to vector<16x32xf32>
    %156 = vector.shape_cast %153 : vector<16x32xf32> to vector<1x16x32xf32>
    tpu.vector_store %arg13[%c1_75, %c0_76, %c0_77], %156 {strides = array<i32>} : memref<2x16x32xf32, #tpu.memory_space<vmem>>, vector<1x16x32xf32>,
    %c1_78 = arith.constant 1 : index
    %c0_79 = arith.constant 0 : index
    %c0_80 = arith.constant 0 : index
    %157 = vector.load %arg14[%c1_78, %c0_79, %c0_80] : memref<2x1x32xf32, #tpu.memory_space<vmem>>, vector<1x1x32xf32>
    %158 = vector.shape_cast %157 : vector<1x1x32xf32> to vector<1x32xf32>
    %159 = vector.shape_cast %145 : vector<1x32xf32> to vector<1x1x32xf32>
    tpu.vector_store %arg14[%c1_78, %c0_79, %c0_80], %159 {strides = array<i32>} : memref<2x1x32xf32, #tpu.memory_space<vmem>>, vector<1x1x32xf32>,
    return
  }
  func.func @transform_0(%arg0: i32) -> (i32, i32, i32) {
    %c0_i32 = arith.constant 0 : i32
    %c0_i32_0 = arith.constant 0 : i32
    %c0_i32_1 = arith.constant 0 : i32
    return %arg0, %c0_i32, %c0_i32_0 : i32, i32, i32
  }
  func.func @transform_1(%arg0: i32) -> (i32, i32, i32) {
    %c0_i32 = arith.constant 0 : i32
    %c0_i32_0 = arith.constant 0 : i32
    %c0_i32_1 = arith.constant 0 : i32
    return %arg0, %c0_i32, %c0_i32_0 : i32, i32, i32
  }
  func.func @transform_2(%arg0: i32) -> (i32, i32, i32) {
    %c0_i32 = arith.constant 0 : i32
    %c0_i32_0 = arith.constant 0 : i32
    %c0_i32_1 = arith.constant 0 : i32
    return %arg0, %c0_i32, %c0_i32_0 : i32, i32, i32
  }
  func.func @transform_3(%arg0: i32) -> (i32, i32, i32) {
    %c0_i32 = arith.constant 0 : i32
    %c0_i32_0 = arith.constant 0 : i32
    %c0_i32_1 = arith.constant 0 : i32
    return %arg0, %c0_i32, %c0_i32_0 : i32, i32, i32
  }
  func.func @transform_4(%arg0: i32) -> (i32, i32) {
    %c0_i32 = arith.constant 0 : i32
    %c0_i32_0 = arith.constant 0 : i32
    %c0_i32_1 = arith.constant 0 : i32
    return %c0_i32, %c0_i32_0 : i32, i32
  }
  func.func @transform_5(%arg0: i32) -> (i32, i32) {
    %c0_i32 = arith.constant 0 : i32
    %c0_i32_0 = arith.constant 0 : i32
    %c0_i32_1 = arith.constant 0 : i32
    return %c0_i32, %c0_i32_0 : i32, i32
  }
  func.func @transform_6(%arg0: i32) -> (i32, i32) {
    %c0_i32 = arith.constant 0 : i32
    %c0_i32_0 = arith.constant 0 : i32
    %c0_i32_1 = arith.constant 0 : i32
    return %c0_i32, %c0_i32_0 : i32, i32
  }
  func.func @transform_7(%arg0: i32) -> (i32, i32) {
    %c0_i32 = arith.constant 0 : i32
    %c0_i32_0 = arith.constant 0 : i32
    %c0_i32_1 = arith.constant 0 : i32
    return %c0_i32, %c0_i32_0 : i32, i32
  }
  func.func @transform_8(%arg0: i32) -> (i32, i32) {
    %c0_i32 = arith.constant 0 : i32
    %c0_i32_0 = arith.constant 0 : i32
    %c0_i32_1 = arith.constant 0 : i32
    return %c0_i32, %c0_i32_0 : i32, i32
  }
  func.func @transform_9(%arg0: i32) -> (i32, i32) {
    %c0_i32 = arith.constant 0 : i32
    %c0_i32_0 = arith.constant 0 : i32
    %c0_i32_1 = arith.constant 0 : i32
    return %c0_i32, %c0_i32_0 : i32, i32
  }
  func.func @transform_10(%arg0: i32) -> (i32, i32) {
    %c0_i32 = arith.constant 0 : i32
    %c0_i32_0 = arith.constant 0 : i32
    %c0_i32_1 = arith.constant 0 : i32
    return %c0_i32, %c0_i32_0 : i32, i32
  }
  func.func @transform_11(%arg0: i32) -> (i32, i32) {
    %c0_i32 = arith.constant 0 : i32
    %c0_i32_0 = arith.constant 0 : i32
    %c0_i32_1 = arith.constant 0 : i32
    return %c0_i32, %c0_i32_0 : i32, i32
  }
  func.func @transform_12(%arg0: i32) -> (i32, i32, i32) {
    %c0_i32 = arith.constant 0 : i32
    %c0_i32_0 = arith.constant 0 : i32
    %c0_i32_1 = arith.constant 0 : i32
    return %arg0, %c0_i32, %c0_i32_0 : i32, i32, i32
  }
  func.func @transform_13(%arg0: i32) -> (i32, i32, i32) {
    %c0_i32 = arith.constant 0 : i32
    %c0_i32_0 = arith.constant 0 : i32
    %c0_i32_1 = arith.constant 0 : i32
    return %arg0, %c0_i32, %c0_i32_0 : i32, i32, i32
  }
}

</mosaic_0001>

<bundles_post_ra>
// kernel: tpu_custom_call.1
= control target key start
LH: loop header
LB: loop body
LE: loop exit
PB: predicated region body
PF: predicated region fallthrough
CT: control target
= control target key end

     0   :  { %s2116_s0 = inlined_call_operand.vmem [shape: bf16[4,16,32], index: 0, kind: input, shape index: {}]   ;;  %s2117_s1 = inlined_call_operand.vmem [shape: bf16[4,8,32], index: 1, kind: input, shape index: {}]   ;;  %s2118_s2 = inlined_call_operand.vmem [shape: f32[4,16,1], index: 2, kind: input, shape index: {}]   ;;  %s2119_s3 = inlined_call_operand.vmem [shape: f32[4,1,8], index: 3, kind: input, shape index: {}]   ;;  %s2120_s4 = inlined_call_operand.vmem [shape: f32[1,32], index: 4, kind: input, shape index: {}]   ;;  %s2121_s5 = inlined_call_operand.vmem [shape: f32[1,32], index: 5, kind: input, shape index: {}]   ;;  %s2122_s6 = inlined_call_operand.vmem [shape: bf16[32,32], index: 6, kind: input, shape index: {}]   ;;  %s2123_s7 = inlined_call_operand.vmem [shape: f32[1,32], index: 7, kind: input, shape index: {}]   ;;  %s2124_s8 = inlined_call_operand.vmem [shape: bf16[32,32], index: 8, kind: input, shape index: {}]   ;;  %s2125_s9 = inlined_call_operand.vmem [shape: f32[1,32], index: 9, kind: input, shape index: {}]   ;;  %s2126_s10 = inlined_call_operand.vmem [shape: bf16[128,32], index: 10, kind: input, shape index: {}]   ;;  %s2127_s11 = inlined_call_operand.vmem [shape: f32[1,32], index: 11, kind: input, shape index: {}]   ;;  %s2128_s12 = inlined_call_operand.hbm [shape: f32[4,16,32], index: 12, kind: output, shape index: {0}]   ;;  %s2129_s13 = inlined_call_operand.hbm [shape: f32[4,1,32], index: 13, kind: output, shape index: {1}]  }
   0x1   :  { %2135 = sst [smem:[#allocation13_spill]] %s2116_s0 }
   0x2   :  { %2136 = sst [smem:[#allocation14_spill]] %s2117_s1 }
   0x3   :  { %2137 = sst [smem:[#allocation15_spill]] %s2118_s2 }
   0x4   :  { %19 = vsyncpa [#allocation3], 0 }
   0x5   :  { %21 = vsyncpa [#allocation3 + $0x1], 0 }
   0x6   :  { %22 = vsyncpa [#allocation5], 0 }
   0x7   :  { %24 = vsyncpa [#allocation5 + $0x1], 0  ;;  %s1776_s25 = smov 0   ;;  %s1778_s26 = smov 0  }
   0x8   :  { %s1780_s27 = smov 0   ;;  %s1782_s28 = smov 0  }
   0x9 LB: > { %2138 = sst [smem:[#allocation8_spill]] %s1683_s25  ;;  %s1797_s29 = sadd.s32 4294967295, %s1695_s28   ;;  %s1695_s28 = sphi %s1782_s28, %s2154_s28   ;;  %s1691_s27 = sphi %s1780_s27, %s2156_s27   ;;  %s1687_s26 = sphi %s1778_s26, %s2158_s26   ;;  %s1683_s25 = sphi %s1776_s25, %s2157_s25  }
   0xa   : > { %2139 = sst [smem:[#allocation9_spill]] %s1691_s27  ;;  %s1365_s30 = sadd.s32 4294967294, %s1695_s28  }
   0xb   : > { %s1801_s14 = sadd.s32 1, %s1695_s28   ;;  %s309_s15 = sadd.s32 1, %s1691_s27 }
   0xc   : > { %2140 = sst [smem:[#allocation10_spill]] %s1801_s14  ;;  %s306_s16 = ssub.s32 %s1695_s28, %s1801_s14 }
   0xd   : > { %p319_p0 = scmp.ne.s32.totalorder %s1691_s27, %s1687_s26  ;;  %p307_p1 = scmp.eq.s32.totalorder %s306_s16, 0 }
   0xe   : > { %p320_p2 = scmp.eq.s32.totalorder %s1797_s29, 1  ;;  %p325_p3 = scmp.ne.s32.totalorder %s1687_s26, %s1683_s25 }
   0xf   : > { %p326_p4 = scmp.eq.s32.totalorder %s1365_s30, 1  ;;  %p1368_p7 = scmp.ge.s32.totalorder %s1695_s28, 1 }
  0x10   : > { %s1812_s17 = scalar_select %p307_p1, %s1691_s27, %s309_s15  }
  0x11   : > { %p1814_p5 = por %p320_p2, %p319_p0  ;;  %p1818_p6 = por %p326_p4, %p325_p3 }
  0x12   : > { %2141 = sst [smem:[#allocation11_spill]] %s1812_s17  ;;  %p431_p8 = scmp.lt.s32.totalorder %s1695_s28, 3 }
  0x13   : > { %s2143_s19 = scalar_select %p1818_p6, 1, 0 }
  0x14   : > { %p432_p9 = pnand %p1368_p7, %p431_p8 }
  0x15   : > { %2144 = sst [smem:[#allocation12_spill]] %s2143_s19  ;;  %s1825_s20 = sshll.u32 (!%p432_p9), %s1797_s29, 1 }
  0x16   : > { %435 = sbr.rel (%p432_p9) target bundleno = 1073 (0x431), region = 68  ;;  %p497_p10 = scmp.lt.s32.totalorder (!%p432_p9), %s1825_s20, 3 }
  0x17   : > { %s2145_s0 = sld [smem:[#allocation13_spill]] (!%p432_p9)  ;;  %s1699_s17 = smov (!%p432_p9), 32  }
  0x18   : > { %s2146_s1 = sld [smem:[#allocation14_spill]] (!%p432_p9)  ;;  %s1701_s25 = smov (!%p432_p9), 96  }
  0x19   : > { %s2147_s2 = sld [smem:[#allocation15_spill]] (!%p432_p9) }
  0x1b   : > { %v1697_v0 = vmov 0   ;;  %s1831_s21 = scalar_select %p497_p10, %s1825_s20, 3  ;;  %vm571_vm0 = vcmask 261120   ;;  %v1851_v3 = vld [vmem:[%s2120_s4] ss:$0 sm:$0xff]  ;;  %v1874_v21 = vld [vmem:[%s2124_s8 + $0x8] sm:$0xff] }
  0x1c   : > { %1535 = vset.pattern.permute.xlu1 %v1697_v0  ;;  %1536 = vset.pattern.permute.xlu2 %v1697_v0  ;;  %v1568_v7 = vld [vmem:[%s2121_s5] ss:$0 sm:$0xff]  ;;  %v1879_v22 = vld [vmem:[%s2122_s6 + $0x8] sm:$0xff]  ;;  %v1698_v44 = vmov -10000.0   ;;  %vm688_vm7 = vcmask 64512   ;;  %vm712_vm12 = vcmask 1043456  }
  0x1d   : > { %s1463_s22 = sshll.u32 %s1831_s21, 3  ;;  %s1375_s23 = sshll.u32 %s1831_s21, 2  ;;  %681 = vmatpush.bf16.msra.mxu2 %v1874_v21  ;;  %652 = vmatpush.bf16.msra.mxu1 %v1879_v22  ;;  %v1886_v23 = vld [vmem:[%s2122_s6] sm:$0xff] }
  0x1e   : > { %s1838_s15 = scalar_lea.vmem %s2145_s0, %s1463_s22  ;;  %s1843_s27 = scalar_lea.vmem %s2146_s1, %s1375_s23  ;;  %v1892_v24 = vld [vmem:[%s2124_s8] sm:$0xff] }
  0x1f   : > { %v555_v1 = vld [vmem:[%s1843_s27] sm:$0xf]  ;;  %s1464_s14 = sshll.u32 %s1831_s21, 4  ;;  %v1899_v26 = vld [vmem:[%s1843_s27 + $0x4] sm:$0xf]  ;;  %v1437_v27 = vld [vmem:[%s1838_s15 + $0x8] sm:$0xff]   ;;  %s1908_s19 = scalar_lea.vmem %s2119_s3, %s1831_s21 }
  0x20   : > { %v553_v2 = vld [vmem:[%s1838_s15] sm:$0xff]   ;;  %v582_v4 = vsel %vm571_vm0, %v555_v1, 0  ;;  %s1860_s30 = scalar_lea.vmem %s2147_s2, %s1464_s14  ;;  %v944_v28 = vsel %vm571_vm0, %v1899_v26, 0  ;;  %v925_v29 = vunpack.c.l.bf16 %v1437_v27  ;;  %v926_v30 = vunpack.c.h.bf16 %v1437_v27  ;;  %s1700_s23 = smov 64  }
  0x21   : > { %v556_v5 = vunpack.c.l.bf16 %v553_v2  ;;  %v557_v6 = vunpack.c.h.bf16 %v553_v2  ;;  %591 = vmatpush.bf16.xpose.msra.mxu0 %v582_v4  ;;  %v598_v8 = vld [vmem:[%s1860_s30] sm:$0xff]  ;;  %v599_v12 = vld [vmem:[%s1860_s30 + $0x8] sm:$0xff]  ;;  %653 = vmatpush.bf16.msra.mxu1 %v1886_v23  ;;  %v1441_v59 = vld [vmem:[%s1860_s30 + $0x10] sm:$0xff]  ;;  %s1621_s0 = scalar_lea.hbm %s2129_s13, 4 }
  0x22   : > { %vm600_vm1 = vcmp.ne.f32.partialorder %v598_v8, 0.0  ;;  %vm601_vm2 = vcmp.ne.f32.partialorder %v599_v12, 0.0  ;;  %v1477_v25 = vld [vmem:[%s1838_s15] sm:$0xff]  ;;  %682 = vmatpush.bf16.msra.mxu2 %v1892_v24  ;;  %v927_v31 = vmul.f32 0.17677669, %v925_v29  ;;  %v932_v39 = vmul.f32 %v1851_v3, %v925_v29  ;;  %v1442_v61 = vld [vmem:[%s1860_s30 + $0x18] sm:$0xff] }
  0x23   : > { %v558_v9 = vmul.f32 0.17677669, %v556_v5  ;;  %v559_v10 = vmul.f32 0.17677669, %v557_v6  ;;  %v604_v11 = vsel %vm600_vm1, 1, %v1697_v0  ;;  %v569_v13 = vmul.f32 %v1851_v3, %v556_v5 }
  0x24   : > { %607 = vperm.xlu1 %1535, %v604_v11   ;;  %v570_v18 = vmul.f32 %v1851_v3, %v557_v6  ;;  %v605_v19 = vsel %vm601_vm2, 1, %v1697_v0  ;;  %1393 = vmatmul.msk.bf16.vlgmr.msra.gmra.mxu1 %vm571_vm0, %v1477_v25  ;;  %v928_v32 = vmul.f32 0.17677669, %v926_v30  ;;  %v929_v33 = vadd.f32 %v1568_v7, %v927_v31  ;;  %v602_v36 = vld [vmem:[%s1908_s19] sm:$0x1] }
  0x25   : > { %v563_v14 = vadd.f32 %v1568_v7, %v558_v9  ;;  %v564_v15 = vadd.f32 %v1568_v7, %v559_v10  ;;  %v572_v16 = vsel %vm571_vm0, %v569_v13, 0.0  ;;  %1402 = vmatmul.msk.bf16.vlgmr.msra.gmra.mxu2 %vm571_vm0, %v555_v1  ;;  %953 = vmatpush.bf16.xpose.msrb.mxu1 %v944_v28  ;;  %vm603_vm3 = vcmp.ne.f32.partialorder %v602_v36, 0.0  ;;  %v1936_v1 = vld [vmem:[%s2125_s9] ss:$0 sm:$0xff]  ;;  %v1478_v36 = vld [vmem:[%s1838_s15 + $0x8] sm:$0xff]  ;;  %s2003_s15 = sand.u32 1, %s1687_s26  }
  0x26   : > { %573 = vadd.xlane.f32.xlu0 %v572_v16  ;;  %v575_v20 = vsel %vm571_vm0, %v570_v18, 0.0  ;;  %v930_v34 = vadd.f32 %v1568_v7, %v928_v32  ;;  %v614_v37 = vsel %vm603_vm3, 1, %v1697_v0  ;;  %v934_v41 = vsel %vm571_vm0, %v932_v39, 0.0  ;;  %v1942_v4 = vld [vmem:[%s2123_s7] ss:$0 sm:$0xff]  ;;  %s1370_s30 = sshll.u32 %s2003_s15, 1 }
  0x27   : > { %v565_v17 = vpack.c.bf16 %v564_v15, %v563_v14  ;;  %v615_v38 = vperm.slane %v614_v37, 0  ;;  %v933_v57 = vmul.f32 %v1851_v3, %v926_v30  ;;  %vm963_vm10 = vcmp.ne.f32.partialorder %v1441_v59, 0.0  ;;  %s2006_s24 = scalar_lea.vmem [#allocation4], %s1370_s30 }
  0x28   : > { %v931_v35 = vpack.c.bf16 %v930_v34, %v929_v33  ;;  %v968_v60 = vsel %vm963_vm10, 1, %v1697_v0  ;;  %vm964_vm11 = vcmp.ne.f32.partialorder %v1442_v61, 0.0  ;;  %s1234_s30 = sshll.u32 %s2006_s24, 4  ;;  %s1235_s30 = int_to_ptr.vmem [resolvable:$true] %s1234_s30 }
  0x29   : > { %1380 = vmatmul.msk.bf16.vlgmr.msra.gmra.mxu0 %vm571_vm0, %v565_v17  ;;  %vm1915_vm4 = vcmp.eq.s32.totalorder %v615_v38, 1  ;;  %v937_v58 = vsel %vm571_vm0, %v933_v57, 0.0  ;;  %v969_v62 = vsel %vm964_vm11, 1, %v1697_v0  ;;  %v1443_v17 = vld [vmem:[%s1908_s19 + $0x1] sm:$0x1]  ;;  %s1205_s19 = scalar_lea.sflag [#allocation5], %s2003_s15 }
  0x2a   : > { %vm967_vm13 = vcmp.ne.f32.partialorder %v1443_v17, 0.0 }
  0x2c   : > { %610 = vperm.xlu1 %1535, %v605_v19  }
  0x2e   : > { %576 = vadd.xlane.f32.xlu0 %v575_v20 }
  0x34   : > { %1440 = vmatmul.msk.bf16.vlgmr.msrb.gmra.mxu1 %vm571_vm0, %v931_v35 }
  0x56   : > { %935 = vadd.xlane.f32.xlu1 %v934_v41 }
  0x96   : > { %v608_v40 = vpop.permute.xlu1 %607 }
  0x97   : > { %vm612_vm5 = vcmp.eq.s32.totalorder %v608_v40, 1 }
  0x98   : > { %vm617_vm6 = vmand %vm612_vm5, %vm1915_vm4  ;;  %vm918_vm5 = vcmask 253952  }
  0x99   : > { %v574_v43 = vpop.xlane.xlu0 %573  ;;  %v619_v45 = vsel %vm617_vm6, 0.0, %v1698_v44  ;;  %vm844_vm6 = vcmask 523264  }
  0x9e   : > { %v611_v47 = vpop.permute.xlu1 %610 }
  0x9f   : > { %vm613_vm8 = vcmp.eq.s32.totalorder %v611_v47, 1 }
  0xa0   : > { %vm618_vm9 = vmand %vm613_vm8, %vm1915_vm4  ;;  %vm789_vm4 = vcmask 130048  }
  0xa1   : > { %v577_v51 = vpop.xlane.xlu0 %576  ;;  %v620_v54 = vsel %vm618_vm9, 0.0, %v1698_v44  ;;  %v655_v63 = vpop.f32.mrf.mxu1 }
  0xa2   : > { %v1949_v9 = vadd.f32 %v1942_v4, %v655_v63 }
  0xa6   : > { %v593_v46 = vpop.f32.mrf.mxu0 }
  0xa7   : > { %v594_v48 = vadd.f32 %v593_v46, %v574_v43 }
  0xa8   : > { %v684_v2 = vpop.f32.mrf.mxu2 }
  0xa9   : > { %v621_v49 = vadd.f32 %v619_v45, %v594_v48  ;;  %v685_v3 = vadd.f32 %v1936_v1, %v684_v2  ;;  %v657_v6 = vpop.f32.mrf.mxu1 }
  0xaa   : > { %v1945_v7 = vadd.f32 %v1942_v4, %v657_v6 }
  0xab   : > { %v689_v50 = vsel %vm688_vm7, %v621_v49, -inf  ;;  %v708_v5 = vpack.c.bf16 %v685_v3, %v685_v3 }
  0xac   : > { %690 = vmax.xlane.f32.xlu2 %v689_v50  ;;  %807 = vmatpush.msra.mxu3 %v1945_v7 }
  0xad   : > { %v714_v8 = vsel %vm712_vm12, %v708_v5, 0 }
  0xae   : > { %v595_v52 = vpop.f32.mrf.mxu0  ;;  %723 = vmatpush.bf16.msrb.mxu2 %v714_v8  ;;  %808 = vmatpush.msra.mxu3 %v1949_v9 }
  0xaf   : > { %v596_v53 = vadd.f32 %v595_v52, %v577_v51 }
  0xb0   : > { %v686_v10 = vpop.f32.mrf.mxu2  ;;  %1015 = vmatpush.bf16.msrb.mxu3 %v1874_v21  ;;  %v978_v21 = vsel %vm967_vm13, 1, %v1697_v0 }
  0xb1   : > { %v622_v55 = vadd.f32 %v620_v54, %v596_v53  ;;  %v979_v29 = vperm.slane %v978_v21, 0  ;;  %v955_v33 = vpop.f32.mrf.mxu1 }
  0xb2   : > { %1001 = vmatpush.bf16.msra.mxu2 %v1879_v22 }
  0xb3   : > { %v692_v56 = vsel %vm688_vm7, %v622_v55, -inf  ;;  %vm1966_vm14 = vcmp.eq.s32.totalorder %v979_v29, 1 }
  0xb4   : > { %693 = vmax.xlane.f32.xlu2 %v692_v56  ;;  %1016 = vmatpush.bf16.msrb.mxu3 %v1892_v24 }
  0xb6   : > { %1002 = vmatpush.bf16.msra.mxu2 %v1886_v23 }
  0xb9   : > { %v957_v45 = vpop.f32.mrf.mxu1 }
  0xbc   : > { %938 = vadd.xlane.f32.xlu2 %v937_v58 }
  0xc9   : > { %v936_v32 = vpop.xlane.xlu1 %935 }
  0xca   : > { %v956_v38 = vadd.f32 %v955_v33, %v936_v32 }
  0xd4   : > { %971 = vperm.xlu2 %1536, %v968_v60  }
  0xdc   : > { %974 = vperm.xlu2 %1536, %v969_v62  }
 0x11f   : > { %v691_v11 = vpop.xlane.xlu2 %690 }
 0x120   : > { %v695_v12 = vsub.f32 %v621_v49, %v691_v11 }
 0x122   : > { %v697_v13 = vmul.f32 1.442695, %v695_v12 }
 0x124   : > { %1573 = vpow2.f32 %v697_v13 }
 0x127   : > { %v694_v14 = vpop.xlane.xlu2 %693 }
 0x128   : > { %v696_v15 = vsub.f32 %v622_v55, %v694_v14  ;;  %v734_v16 = vmax.f32 %v691_v11, %v694_v14 }
 0x12a   : > { %v699_v18 = vmul.f32 1.442695, %v696_v15  ;;  %v735_v19 = vrot.slane %v734_v16, 4  ;;  %v1959_v27 = vpop.eup %1573 }
 0x12c   : > { %1575 = vpow2.f32 %v699_v18  ;;  %v736_v20 = vmax.f32 %v734_v16, %v735_v19 }
 0x12e   : > { %v737_v22 = vrot.slane %v736_v20, 2 }
 0x12f   : > { %v939_v25 = vpop.xlane.xlu2 %938 }
 0x130   : > { %v738_v23 = vmax.f32 %v736_v20, %v737_v22  ;;  %v958_v49 = vadd.f32 %v957_v45, %v939_v25 }
 0x132   : > { %v1961_v24 = vpop.eup %1575  ;;  %v739_v28 = vrot.slane %v738_v23, 1 }
 0x133   : > { %v707_v30 = vpack.c.bf16 %v1961_v24, %v1959_v27 }
 0x134   : > { %v740_v31 = vmax.f32 %v738_v23, %v739_v28  ;;  %v704_v28 = vsel %vm688_vm7, %v1961_v24, 0.0 }
 0x135   : > { %1403 = vmatmul.msk.bf16.vlgmr.msrb.gmra.mxu2 %vm688_vm7, %v707_v30 }
 0x136   : > { %v741_v34 = vsub.f32 %v691_v11, %v740_v31  ;;  %v742_v35 = vsub.f32 %v694_v14, %v740_v31 }
 0x137   : > { %v972_v37 = vpop.permute.xlu2 %971 }
 0x138   : > { %v743_v39 = vmul.f32 1.442695, %v741_v34  ;;  %v745_v40 = vmul.f32 1.442695, %v742_v35  ;;  %vm976_vm15 = vcmp.eq.s32.totalorder %v972_v37, 1 }
 0x139   : > { %vm981_vm1 = vmand %vm976_vm15, %vm1966_vm14 }
 0x13a   : > { %1577 = vpow2.f32 %v745_v40  ;;  %v983_v41 = vsel %vm981_vm1, 0.0, %v1698_v44 }
 0x13b   : > { %v985_v42 = vadd.f32 %v983_v41, %v956_v38  ;;  %1579 = vpow2.f32 %v743_v39 }
 0x13d   : > { %v1022_v43 = vsel %vm688_vm7, %v985_v42, -inf }
 0x13e   : > { %1023 = vmax.xlane.f32.xlu2 %v1022_v43 }
 0x13f   : > { %v975_v46 = vpop.permute.xlu2 %974 }
 0x140   : > { %v1578_v47 = vpop.eup %1577  ;;  %vm977_vm2 = vcmp.eq.s32.totalorder %v975_v46, 1  ;;  %v701_v46 = vsel %vm688_vm7, %v1959_v27, 0.0 }
 0x141   : > { %v1580_v48 = vpop.eup %1579  ;;  %vm982_vm3 = vmand %vm977_vm2, %vm1966_vm14 }
 0x142   : > { %v984_v50 = vsel %vm982_vm3, 0.0, %v1698_v44  ;;  %v747_v51 = vadd.f32 %v1580_v48, %v1578_v47 }
 0x143   : > { %v986_v52 = vadd.f32 %v984_v50, %v958_v49 }
 0x144   : > { %v748_v53 = vrot.slane %v747_v51, 4 }
 0x145   : > { %v1025_v54 = vsel %vm688_vm7, %v986_v52, -inf  ;;  %1448 = vmatmul.msk.bf16.vlgmr.msra.gmra.mxu2 %vm571_vm0, %v1478_v36 }
 0x146   : > { %1026 = vmax.xlane.f32.xlu1 %v1025_v54  ;;  %v749_v55 = vadd.f32 %v748_v53, %v747_v51 }
 0x148   : > { %v750_v56 = vrot.slane %v749_v55, 2 }
 0x14a   : > { %v751_v57 = vadd.f32 %v750_v56, %v749_v55 }
 0x14c   : > { %v752_v58 = vrot.slane %v751_v57, 1 }
 0x14e   : > { %v753_v59 = vadd.f32 %v752_v58, %v751_v57 }
 0x150   : > { %1581 = vrcp.f32 %v753_v59 }
 0x156   : > { %v1582_v60 = vpop.eup %1581 }
 0x157   : > { %v755_v61 = vmul.f32 %v1582_v60, %v1580_v48  ;;  %v756_v62 = vmul.f32 %v1582_v60, %v1578_v47 }
 0x159   : > { %757 = vxpose.xlu0.b32.start [1/2] (short) (narrow) %v755_v61, 8 }
 0x161   : > { %758 = vxpose.xlu0.b32.end [2/2] (short) (narrow) %v756_v62, 8 }
 0x1b1   : > { %v1024_v63 = vpop.xlane.xlu2 %1023 }
 0x1b2   : > { %v1028_v2 = vsub.f32 %v985_v42, %v1024_v63 }
 0x1b4   : > { %v1030_v44 = vmul.f32 1.442695, %v1028_v2 }
 0x1b6   : > { %1583 = vpow2.f32 %v1030_v44 }
 0x1b8   : > { %v725_v42 = vpop.f32.mrf.mxu2 }
 0x1b9   : > { %v1027_v3 = vpop.xlane.xlu1 %1026 }
 0x1ba   : > { %v1029_v5 = vsub.f32 %v986_v52, %v1027_v3  ;;  %v1066_v6 = vmax.f32 %v1024_v63, %v1027_v3 }
 0x1bc   : > { %v1978_v8 = vpop.eup %1583  ;;  %v1032_v10 = vmul.f32 1.442695, %v1029_v5  ;;  %v1067_v11 = vrot.slane %v1066_v6, 4 }
 0x1bd   : > { %v1034_v12 = vsel %vm688_vm7, %v1978_v8, 0.0 }
 0x1be   : > { %1585 = vpow2.f32 %v1032_v10  ;;  %v1068_v13 = vmax.f32 %v1066_v6, %v1067_v11  ;;  %1035 = vadd.xlane.f32.xlu1 %v1034_v12 }
 0x1c0   : > { %v1069_v14 = vrot.slane %v1068_v13, 2  ;;  %v727_v43 = vpop.f32.mrf.mxu2 }
 0x1c2   : > { %v1070_v15 = vmax.f32 %v1068_v13, %v1069_v14 }
 0x1c4   : > { %v1586_v16 = vpop.eup %1585  ;;  %v1071_v17 = vrot.slane %v1070_v15, 1 }
 0x1c5   : > { %v1040_v18 = vpack.c.bf16 %v1586_v16, %v1978_v8  ;;  %v1037_v19 = vsel %vm688_vm7, %v1586_v16, 0.0 }
 0x1c6   : > { %v1072_v20 = vmax.f32 %v1070_v15, %v1071_v17  ;;  %1038 = vadd.xlane.f32.xlu1 %v1037_v19 }
 0x1c8   : > { %v1073_v22 = vsub.f32 %v1024_v63, %v1072_v20  ;;  %v1074_v25 = vsub.f32 %v1027_v3, %v1072_v20  ;;  %v1004_v45 = vpop.f32.mrf.mxu2 }
 0x1c9   : > { %v1995_v48 = vadd.f32 %v1942_v4, %v1004_v45 }
 0x1ca   : > { %v1075_v21 = vmul.f32 1.442695, %v1073_v22  ;;  %v1077_v23 = vmul.f32 1.442695, %v1074_v25 }
 0x1cc   : > { %1587 = vpow2.f32 %v1077_v23  ;;  %v1475_v23 = vld [vmem:[%s2126_s10 + $0x30] sm:$0xff] }
 0x1cd   : > { %1589 = vpow2.f32 %v1075_v21  ;;  %v1476_v21 = vld [vmem:[%s2126_s10 + $0x38] sm:$0xff] }
 0x1ce   : > { %705 = vadd.xlane.f32.xlu1 %v704_v28  ;;  %902 = vmatpush.bf16.msrb.mxu0 %v1476_v21  ;;  %v1474_v28 = vld [vmem:[%s2126_s10 + $0x28] sm:$0xff] }
 0x1d0   : > { %v1006_v47 = vpop.f32.mrf.mxu2 }
 0x1d1   : > { %v1998_v49 = vadd.f32 %v1942_v4, %v1006_v47 }
 0x1d2   : > { %v1588_v29 = vpop.eup %1587  ;;  %903 = vmatpush.bf16.msrb.mxu0 %v1475_v23 }
 0x1d3   : > { %v1590_v30 = vpop.eup %1589  ;;  %1138 = vmatpush.msrb.mxu2 %v1998_v49 }
 0x1d4   : > { %v1079_v31 = vadd.f32 %v1590_v30, %v1588_v29 }
 0x1d5   : > { %1139 = vmatpush.msrb.mxu2 %v1995_v48 }
 0x1d6   : > { %v1080_v32 = vrot.slane %v1079_v31, 4  ;;  %904 = vmatpush.bf16.msrb.mxu0 %v1474_v28 }
 0x1d8   : > { %v1081_v33 = vadd.f32 %v1080_v32, %v1079_v31  ;;  %v1471_v31 = vld [vmem:[%s2126_s10 + $0x10] sm:$0xff]  ;;  %v1470_v32 = vld [vmem:[%s2126_s10 + $0x8] sm:$0xff] }
 0x1da   : > { %v1082_v34 = vrot.slane %v1081_v33, 2 }
 0x1dc   : > { %v1083_v35 = vadd.f32 %v1082_v34, %v1081_v33  ;;  %v1469_v33 = vld [vmem:[%s2126_s10] sm:$0xff] }
 0x1de   : > { %v1084_v37 = vrot.slane %v1083_v35, 1 }
 0x1e0   : > { %v1085_v38 = vadd.f32 %v1084_v37, %v1083_v35 }
 0x1e2   : > { %1591 = vrcp.f32 %v1085_v38 }
 0x1e8   : > { %v1592_v39 = vpop.eup %1591 }
 0x1e9   : > { %v1087_v40 = vmul.f32 %v1592_v39, %v1590_v30  ;;  %v1088_v41 = vmul.f32 %v1592_v39, %v1588_v29  ;;  %v1473_v29 = vld [vmem:[%s2126_s10 + $0x20] sm:$0xff]  ;;  %v1472_v30 = vld [vmem:[%s2126_s10 + $0x18] sm:$0xff] }
 0x1ea   : > { %905 = vmatpush.bf16.msrb.mxu0 %v1473_v29 }
 0x1eb   : > { %1089 = vxpose.xlu0.b32.start [1/2] (short) (narrow) %v1087_v40, 8 }
 0x1ee   : > { %906 = vmatpush.bf16.msrb.mxu0 %v1472_v30 }
 0x1f2   : > { %907 = vmatpush.bf16.msrb.mxu0 %v1471_v31 }
 0x1f3   : > { %1090 = vxpose.xlu0.b32.end [2/2] (short) (narrow) %v1088_v41, 8 }
 0x1f6   : > { %908 = vmatpush.bf16.msrb.mxu0 %v1470_v32 }
 0x1fa   : > { %909 = vmatpush.bf16.msrb.mxu0 %v1469_v33 }
 0x1fd   : > { %v773_v24 = vpop.trf.xlu0 }
 0x1fe   : > { %1404 = vmatmul.msk.f32.vlgmr.msra.gmra.mxu3 %vm789_vm4, %v773_v24 }
 0x1ff   : > { %1180 = vmatpush.bf16.msra.mxu3 %v1476_v21 }
 0x203   : > { %1181 = vmatpush.bf16.msra.mxu3 %v1475_v23 }
 0x206   : > { %1449 = vmatmul.msk.bf16.vlgmr.msrb.gmra.mxu3 %vm571_vm0, %v1899_v26 }
 0x207   : > { %1182 = vmatpush.bf16.msra.mxu3 %v1474_v28 }
 0x20b   : > { %1183 = vmatpush.bf16.msra.mxu3 %v1473_v29 }
 0x20f   : > { %1184 = vmatpush.bf16.msra.mxu3 %v1472_v30 }
 0x213   : > { %1185 = vmatpush.bf16.msra.mxu3 %v1471_v31 }
 0x217   : > { %1186 = vmatpush.bf16.msra.mxu3 %v1470_v32 }
 0x21b   : > { %1187 = vmatpush.bf16.msra.mxu3 %v1469_v33 }
 0x231   : > { %v1036_v53 = vpop.xlane.xlu1 %1035 }
 0x239   : > { %v1039_v54 = vpop.xlane.xlu1 %1038 }
 0x241   : > { %v706_v55 = vpop.xlane.xlu1 %705 }
 0x242   : > { %1593 = vrcp.f32 %v706_v55 }
 0x248   : > { %v1594_v57 = vpop.eup %1593 }
 0x249   : > { %v733_v59 = vmul.f32 %v1594_v57, %v727_v43 }
 0x24b   : > { %v814_v22 = vmul.f32 %v733_v59, %v1945_v7 }
 0x25a   : > { %1567 = vset.pattern.permute.xlu0 %v1697_v0 }
 0x264   : > { %702 = vadd.xlane.f32.xlu0 %v701_v46 }
 0x281   : > { %v810_v0 = vpop.f32.mrf.mxu3 }
 0x282   : > { %919 = vst.msk [vmem:[%s2006_s24] sm:$0x1] %vm918_vm5, %v810_v0  ;;  %v815_v58 = vperm.slane %v810_v0, 0 }
 0x284   : > { %v817_v61 = vmul.f32 %v815_v58, %v733_v59 }
 0x289   : > { %v1018_v26 = vpop.f32.mrf.mxu3 }
 0x28a   : > { %v1019_v27 = vadd.f32 %v1936_v1, %v1018_v26 }
 0x28c   : > { %v1041_v4 = vpack.c.bf16 %v1019_v27, %v1019_v27 }
 0x28e   : > { %v1046_v50 = vsel %vm712_vm12, %v1041_v4, 0 }
 0x28f   : > { %1055 = vmatpush.bf16.msra.mxu1 %v1046_v50  ;;  %v1105_v51 = vpop.trf.xlu0 }
 0x290   : > { %1451 = vmatmul.msk.f32.vlgmr.msrb.gmra.mxu2 %vm789_vm4, %v1105_v51 }
 0x291   : > { %v1020_v52 = vpop.f32.mrf.mxu3 }
 0x292   : > { %1450 = vmatmul.msk.bf16.vlgmr.msra.gmra.mxu1 %vm688_vm7, %v1040_v18  ;;  %vm847_vm7 = vcmask 785408  }
 0x2d7   : > { %v703_v56 = vpop.xlane.xlu0 %702 }
 0x2d8   : > { %1595 = vrcp.f32 %v703_v56 }
 0x2d9   : > { %1597 = vrcp.f32 %v1036_v53 }
 0x2da   : > { %1599 = vrcp.f32 %v1039_v54 }
 0x2de   : > { %v1596_v1 = vpop.eup %1595 }
 0x2df   : > { %v732_v60 = vmul.f32 %v1596_v1, %v725_v42  ;;  %v1598_v5 = vpop.eup %1597 }
 0x2e0   : > { %v1600_v10 = vpop.eup %1599 }
 0x2e1   : > { %v1537_v62 = vpack.i.bf16 %v733_v59, %v732_v60  ;;  %v816_v63 = vmul.f32 %v815_v58, %v732_v60  ;;  %v813_v20 = vmul.f32 %v732_v60, %v1949_v9 }
 0x2e3   : > { %1538 = vrot.lane.b32.xlu2 %v1537_v62, %s1699_s17  ;;  %v1562_v2 = vpack.i.bf16 %v817_v61, %v816_v63  ;;  %v1557_v25 = vpack.i.bf16 %v814_v22, %v813_v20 }
 0x30f   : > { %v1057_v44 = vpop.f32.mrf.mxu1 }
 0x310   : > { %v1064_v6 = vmul.f32 %v1598_v5, %v1057_v44 }
 0x312   : > { %v1144_v13 = vmul.f32 %v1064_v6, %v1995_v48 }
 0x313   : > { %v1141_v3 = vpop.f32.mrf.mxu2 }
 0x314   : > { %1454 = vst.msk [vmem:[%s2006_s24 + $0x1] sm:$0x1] %vm918_vm5, %v1141_v3  ;;  %v1146_v8 = vperm.slane %v1141_v3, 0 }
 0x316   : > { %v1147_v14 = vmul.f32 %v1146_v8, %v1064_v6 }
 0x317   : > { %v1059_v11 = vpop.f32.mrf.mxu1 }
 0x318   : > { %v1065_v12 = vmul.f32 %v1600_v10, %v1059_v11 }
 0x31a   : > { %v1145_v15 = vmul.f32 %v1065_v12, %v1998_v49  ;;  %v1148_v16 = vmul.f32 %v1146_v8, %v1065_v12  ;;  %v1542_v17 = vpack.i.bf16 %v1065_v12, %v1064_v6 }
 0x31c   : > { %1543 = vrot.lane.b32.xlu1 %v1542_v17, %s1699_s17  ;;  %v1547_v18 = vpack.i.bf16 %v1145_v15, %v1144_v13  ;;  %v1552_v19 = vpack.i.bf16 %v1148_v16, %v1147_v14 }
 0x31e   : > { %1548 = vrot.lane.b32.xlu2 %v1547_v18, %s1700_s23 }
 0x324   : > { %1553 = vrot.lane.b32.xlu1 %v1552_v19, %s1701_s25 }
 0x326   : > { %1563 = vrot.lane.b32.xlu2 %v1562_v2, %s1701_s25  ;;  %s1233_s25 = scalar_lea.hbm %s2129_s13, %s1825_s20 }
 0x327   : > { %s1236_s14 = sshll.u32 %s1233_s25, 4  ;;  %s1237_s14 = int_to_ptr.hbm [resolvable:$true] %s1236_s14 }
 0x328   : > { %s1615_s27 = sshra.s32 %s1237_s14, 4  ;;  %s1616_s27 = int_to_ptr.hbm [resolvable:$true] %s1615_s27 }
 0x329   : > { %s1617_s21 = scalar_lea.hbm %s1616_s27, 2  ;;  %p1622_p0 = scmp.lt.s32.totalorder %s1616_s27, %s2129_s13 }
 0x32a   : > { %p1618_p11 = scmp.ne.s32.totalorder %s1616_s27, %s1617_s21  ;;  %p1623_p1 = scmp.lt.s32.totalorder %s1621_s0, %s1617_s21 }
 0x32c   : > { %1558 = vrot.lane.b32.xlu1 %v1557_v25, %s1700_s23  ;;  %p1619_p12 = pnand %p1618_p11, %p1814_p5  ;;  %p1624_p2 = por %p1623_p1, %p1622_p0 }
 0x32e   : > { %p1620_p13 = pneg %p1619_p12 }
 0x330   : > { %p1625_p3 = pnand %p1624_p2, %p1620_p13 }
 0x33d   : > { %v1539_v34 = vpop.permute.xlu2 %1538 }
 0x33e   : > { %v1540_v4 = vunpack.i.l.bf16 %v1539_v34 }
 0x340   : > { %v842_v54 = vsel %vm571_vm0, %v1949_v9, %v1540_v4 }
 0x378   : > { %v1549_v38 = vpop.permute.xlu2 %1548 }
 0x379   : > { %v1551_v41 = vunpack.i.h.bf16 %v1549_v38  ;;  %v1550_v24 = vunpack.i.l.bf16 %v1549_v38 }
 0x38e   : > { %v1544_v35 = vpop.permute.xlu1 %1543 }
 0x38f   : > { %v1546_v36 = vunpack.i.h.bf16 %v1544_v35  ;;  %v1545_v37 = vunpack.i.l.bf16 %v1544_v35 }
 0x391   : > { %v1174_v39 = vsel %vm571_vm0, %v1998_v49, %v1546_v36  ;;  %v1173_v40 = vsel %vm571_vm0, %v1995_v48, %v1545_v37  ;;  %v1541_v49 = vunpack.i.h.bf16 %v1539_v34  ;;  %v1564_v48 = vpop.permute.xlu2 %1563 }
 0x392   : > { %v1175_v46 = vsel %vm844_vm6, %v1173_v40, %v1550_v24  ;;  %v1176_v47 = vsel %vm844_vm6, %v1174_v39, %v1551_v41  ;;  %v1566_v55 = vunpack.i.h.bf16 %v1564_v48  ;;  %v1565_v56 = vunpack.i.l.bf16 %v1564_v48 }
 0x393   : > { %v843_v53 = vsel %vm571_vm0, %v1945_v7, %v1541_v49 }
 0x396   : > { %v1554_v42 = vpop.permute.xlu1 %1553 }
 0x397   : > { %v1556_v43 = vunpack.i.h.bf16 %v1554_v42  ;;  %v1555_v45 = vunpack.i.l.bf16 %v1554_v42 }
 0x399   : > { %v1177_v0 = vsel %vm847_vm7, %v1175_v46, %v1555_v45  ;;  %v1178_v26 = vsel %vm847_vm7, %v1176_v47, %v1556_v43 }
 0x39a   : > { %v1179_v27 = vpack.c.bf16 %v1178_v26, %v1177_v0 }
 0x39c   : > { %1188 = vmatmul.bf16.vlgmr.msra.gmra.mxu3 %v1179_v27 }
 0x39e   : > { %v1559_v50 = vpop.permute.xlu1 %1558 }
 0x39f   : > { %v1561_v51 = vunpack.i.h.bf16 %v1559_v50  ;;  %v1560_v52 = vunpack.i.l.bf16 %v1559_v50 }
 0x3a1   : > { %v846_v57 = vsel %vm844_vm6, %v843_v53, %v1561_v51  ;;  %v845_v58 = vsel %vm844_vm6, %v842_v54, %v1560_v52 }
 0x3a2   : > { %v848_v1 = vsel %vm847_vm7, %v845_v58, %v1565_v56  ;;  %v849_v59 = vsel %vm847_vm7, %v846_v57, %v1566_v55 }
 0x3a3   : > { %v850_v60 = vpack.c.bf16 %v849_v59, %v848_v1 }
 0x3a5   : > { %910 = vmatmul.bf16.vlgmr.msrb.gmra.mxu0 %v850_v60 }
 0x3a6   : > { %1628 = shalt.err (!%p1625_p3)
}
 0x3a7   : > { %s1702_s20 = smov 16   ;;  %s1703_s17 = smov 1   ;;  %v1572_v7 = vld [vmem:[%s2127_s11] ss:$0 sm:$0xff] }
 0x3a8   : > { %1482 = dma.vmem_to_hbm [thread:$0]  (%p1814_p5), %s1235_s30, 32, %s1237_s14, %s1205_s19, %s1702_s20, %s1702_s20, %s1703_s17  }
 0x3a9   : > { %s1369_s23 = sshll.u32 %s2003_s15, 5  ;;  %s1480_s1 = sshll.u32 %s1797_s29, 5 }
 0x3aa   : > { %s488_s27 = scalar_lea.vmem [#allocation2], %s1369_s23  ;;  %s1217_s16 = scalar_lea.hbm %s2128_s12, %s1480_s1 }
 0x3ab   : > { %s1218_s30 = sshll.u32 %s488_s27, 4  ;;  %s1220_s2 = sshll.u32 %s1217_s16, 4  ;;  %s1219_s30 = int_to_ptr.vmem [resolvable:$true] %s1218_s30  ;;  %s1221_s2 = int_to_ptr.hbm [resolvable:$true] %s1220_s2 }
 0x3ac   : > { %s1200_s29 = scalar_lea.sflag [#allocation3], %s2003_s15  ;;  %s1643_s14 = sshra.s32 %s1221_s2, 4  ;;  %s1644_s14 = int_to_ptr.hbm [resolvable:$true] %s1643_s14 }
 0x3ad   : > { %s1645_s19 = scalar_lea.hbm %s1644_s14, 32  ;;  %s1649_s20 = scalar_lea.hbm %s2128_s12, 64 }
 0x3ae   : > { %p1646_p4 = scmp.ne.s32.totalorder %s1644_s14, %s1645_s19  ;;  %p1650_p9 = scmp.lt.s32.totalorder %s1644_s14, %s2128_s12 }
 0x3af   : > { %p1651_p10 = scmp.lt.s32.totalorder %s1649_s20, %s1645_s19 }
 0x3b0   : > { %p1647_p7 = pnand %p1646_p4, %p1814_p5 }
 0x3b1   : > { %p1652_p11 = por %p1651_p10, %p1650_p9 }
 0x3b2   : > { %p1648_p8 = pneg %p1647_p7 }
 0x3b4   : > { %p1653_p12 = pnand %p1652_p11, %p1648_p8 }
 0x41f   : > { %v1189_v9 = vpop.f32.mrf.mxu3 }
 0x420   : > { %v1190_v61 = vadd.f32 %v1572_v7, %v1189_v9 }
 0x422   : > { %1452 = vst.msk [vmem:[%s488_s27 + $0x10] sm:$0xff] %vm571_vm0, %v1190_v61  ;;  %v911_v62 = vpop.f32.mrf.mxu0 }
 0x423   : > { %v912_v63 = vadd.f32 %v1572_v7, %v911_v62 }
 0x425   : > { %916 = vst.msk [vmem:[%s488_s27] sm:$0xff] %vm571_vm0, %v912_v63 }
 0x427   : > { %v1191_v2 = vpop.f32.mrf.mxu3 }
 0x428   : > { %v1192_v44 = vadd.f32 %v1572_v7, %v1191_v2 }
 0x42a   : > { %1453 = vst.msk [vmem:[%s488_s27 + $0x18] sm:$0xff] %vm571_vm0, %v1192_v44  ;;  %v913_v3 = vpop.f32.mrf.mxu0 }
 0x42b   : > { %v914_v5 = vadd.f32 %v1572_v7, %v913_v3 }
 0x42d   : > { %917 = vst.msk [vmem:[%s488_s27 + $0x8] sm:$0xff] %vm571_vm0, %v914_v5 }
 0x42e   : > { %1656 = shalt.err (!%p1653_p12)
}
 0x42f   : > { %s1704_s15 = smov 128   ;;  %s1705_s25 = smov 8  }
 0x430   : > { %1481 = dma.vmem_to_hbm [thread:$0]  (%p1814_p5), %s1219_s30, 512, %s1221_s2, %s1200_s29, %s1704_s15, %s1704_s15, %s1705_s25  }
 0x431 PF: > { %s2152_s1 = sld [smem:[#allocation8_spill]]  ;;  %p1492_p13 = scmp.ge.s32.totalorder %s1695_s28, 2 }
 0x433   : > { %p1486_p0 = pnand %p1492_p13, %p1818_p6 }
 0x435   : > { %p1487_p1 = pneg %p1486_p0 }
 0x437   : > { %s1251_s0 = sand.u32 1, %s2152_s1  }
 0x438   : > { %s1252_s21 = scalar_lea.sflag [#allocation3], %s1251_s0 }
 0x439   : > { %1674 = dma.done.wait (%p1487_p1), %s1252_s21, 512  }
 0x43a   : > { %1676 = vsyncadd (%p1487_p1), %s1252_s21, 4294966784  ;;  %s1262_s16 = scalar_lea.sflag [#allocation5], %s1251_s0 }
 0x43b   : > { %1678 = dma.done.wait (%p1487_p1), %s1262_s16, 32  }
 0x43c   : > { %1680 = vsyncadd (%p1487_p1), %s1262_s16, 4294967264  ;;  %s2154_s28 = sld [smem:[#allocation10_spill]]  ;;  %s2157_s25 = smov %s1687_s26 }
 0x43d   : > { %s2155_s14 = sld [smem:[#allocation9_spill]] }
 0x43e   : > { %s2156_s27 = sld [smem:[#allocation11_spill]] }
 0x442   : > { %p27_p5 = scmp.ge.s32.totalorder %s2154_s28, 4  }
 0x443   : > { %s2158_s26 = smov %s2155_s14 }
 0x444   :  { %29 = sbr.rel (!%p27_p5) target bundleno = 9 (0x9), region = 135 }
 0x449   :  { %1268 = vsyncpa [#allocation3], 1 }
 0x44a   :  { %1270 = vsyncpa [#allocation3 + $0x1], 1 }
 0x44b   :  { %1271 = vsyncpa [#allocation5], 1 }
 0x44c   :  { %1273 = vsyncpa [#allocation5 + $0x1], 1 }

</bundles_post_ra>
